<compile_context>
chip_gen: v7x
topology: tpu7x:2x2x1
jax: 0.10.0
libtpu: 0.0.40
codegen_flags: <defaults>
</compile_context>

<pallas_src>
import jax
import jax.numpy as jnp
from jax.experimental import pallas as pl
from jax.experimental.pallas import tpu as pltpu


def _round_up(x, m):
    return (x + m - 1) // m * m


def mesh_conv_kernel(img_ref, w_ref, b_ref, o_ref):
    # img_ref: (1, 5, Cin, TE)  gathered 1-ring features, E on lanes
    # w_ref:   (Cout, 5*Cin)    nn.Linear weight (original layout, f32)
    # b_ref:   (Cout, 1)        nn.Linear bias (f32)
    # o_ref:   (1, Cout, TE)    per-edge output features, E on lanes
    f0 = img_ref[0, 0].astype(jnp.float32)
    f1 = img_ref[0, 1].astype(jnp.float32)
    f2 = img_ref[0, 2].astype(jnp.float32)
    f3 = img_ref[0, 3].astype(jnp.float32)
    f4 = img_ref[0, 4].astype(jnp.float32)

    # Symmetric (order-invariant) functions over opposite neighbor pairs (VPU),
    # stacked along the contraction axis in PyTorch's concat order
    # -> single fused K = 5*Cin matmul on the MXU.
    g = jnp.concatenate(
        [f0, f1 + f3, f2 + f4, jnp.abs(f1 - f3), jnp.abs(f2 - f4)], axis=0
    )  # (5*Cin, TE)

    acc = jnp.dot(w_ref[...], g, preferred_element_type=jnp.float32)  # (Cout, TE)
    o_ref[0] = (acc + b_ref[...]).astype(o_ref.dtype)


def mesh_conv_forward(x, edgemat, weight, bias, *, compute_dtype=jnp.bfloat16):
    """MeshConv forward.

    x:       (B, Cin, E, 1) float32 edge features (PyTorch layout)
    edgemat: (B, E, 5) int32 -- per-edge [self, 4 one-ring neighbors] indices
    weight:  (Cout, 5*Cin) float32 -- nn.Linear weight
    bias:    (Cout,) float32 -- nn.Linear bias
    returns: (B, Cout, E, 1) float32
    """
    B, Cin, E, _ = x.shape
    Cout = weight.shape[0]
    assert weight.shape == (Cout, 5 * Cin)
    assert edgemat.shape == (B, E, 5)

    # ---- E tiling: lane-dense tiles, multiple of 128, capped at 512 ----
    if E <= 512:
        E_pad = _round_up(E, 128)
        TE = E_pad
    else:
        TE = 512
        E_pad = _round_up(E, TE)

    # ---- glue (plain JAX): gather directly into the kernel layout ----
    # (B, Cin, E); cast to bf16 BEFORE the gather so the 5x-inflated gathered
    # tensor costs half the HBM bytes.
    xc = x[..., 0].astype(compute_dtype)
    em = jnp.transpose(edgemat, (0, 2, 1)).astype(jnp.int32)        # (B, 5, E)
    if E_pad != E:
        em = jnp.pad(em, ((0, 0), (0, 0), (0, E_pad - E)))          # pad with edge 0

    # img[b, j, c, e] = xc[b, c, em[b, j, e]]  ->  (B, 5, Cin, E_pad)
    img = jax.vmap(                                                 # over batch
        jax.vmap(lambda xb, ej: xb[:, ej], in_axes=(None, 0))       # over the 5 axis
    )(xc, em)

    w = weight.astype(jnp.float32)                                  # (Cout, 5*Cin), resident
    b2 = bias.reshape(Cout, 1).astype(jnp.float32)

    out = pl.pallas_call(
        mesh_conv_kernel,
        out_shape=jax.ShapeDtypeStruct((B, Cout, E_pad), jnp.float32),
        grid_spec=pltpu.PrefetchScalarGridSpec(
            num_scalar_prefetch=0,
            grid=(B, E_pad // TE),
            in_specs=[
                pl.BlockSpec((1, 5, Cin, TE), lambda b, e: (b, 0, 0, e)),
                # constant index_maps -> weight/bias stay VMEM-resident
                pl.BlockSpec((Cout, 5 * Cin), lambda b, e: (0, 0)),
                pl.BlockSpec((Cout, 1), lambda b, e: (0, 0)),
            ],
            out_specs=pl.BlockSpec((1, Cout, TE), lambda b, e: (b, 0, e)),
        ),
        compiler_params=pltpu.CompilerParams(
            # both axes independent -> megacore sharding on v7x even for B=1
            dimension_semantics=("parallel", "parallel"),
            # double-buffered (1,5,Cin,TE) bf16 + (1,Cout,TE) f32 tiles are
            # tiny for realistic MeshCNN channel counts; far under any limit.
            vmem_limit_bytes=32 * 1024 * 1024,
        ),
    )(img, w, b2)                                                   # (B, Cout, E_pad)

    # Drop padded edges (they only received bias + gather-of-edge-0 garbage)
    # and restore the PyTorch output layout (B, Cout, E, 1).
    return out[:, :, :E][..., None]


def _reference_forward(x, edgemat, weight, bias):
    """Pure-JAX f32 reference mirroring the PyTorch module (sanity check)."""
    xe = jnp.transpose(x[..., 0], (0, 2, 1))                 # (B, E, Cin)
    f = jax.vmap(lambda xb, eb: xb[eb])(xe, edgemat)         # (B, E, 5, Cin)
    f0, f1, f2, f3, f4 = (f[:, :, j, :] for j in range(5))
    G = jnp.concatenate(
        [f0, f1 + f3, f2 + f4, jnp.abs(f1 - f3), jnp.abs(f2 - f4)], axis=-1)
    y = G @ weight.T + bias                                  # (B, E, Cout)
    return jnp.transpose(y, (0, 2, 1))[..., None]


if __name__ == "__main__":
    B, Cin, E, Cout, K = 2, 8, 200, 16, 5

    key = jax.random.PRNGKey(0)
    kx, ke, kw, kb = jax.random.split(key, 4)

    x = jax.random.normal(kx, (B, Cin, E, 1), dtype=jnp.float32)

    # Synthetic mesh connectivity: each edge's row is [self, 4 random neighbors].
    nbrs = jax.random.randint(ke, (B, E, 4), 0, E, dtype=jnp.int32)
    self_idx = jnp.broadcast_to(
        jnp.arange(E, dtype=jnp.int32)[None, :, None], (B, E, 1))
    edgemat = jnp.concatenate([self_idx, nbrs], axis=-1)     # (B, E, 5)

    # Deterministic Linear(5*Cin, Cout) parameters.
    weight = (jax.random.normal(kw, (Cout, K * Cin), dtype=jnp.float32)
              * (1.0 / jnp.sqrt(K * Cin)))
    bias = jax.random.normal(kb, (Cout,), dtype=jnp.float32) * 0.01

    ref = _reference_forward(x, edgemat, weight, bias)

    # f32 path: tight check of the kernel math itself.
    out_f32 = mesh_conv_forward(x, edgemat, weight, bias,
                                compute_dtype=jnp.float32)
    out_f32 = jax.block_until_ready(out_f32)
    assert out_f32.shape == (B, Cout, E, 1)
    assert jnp.allclose(out_f32, ref, atol=2e-2, rtol=2e-2), \
        float(jnp.max(jnp.abs(out_f32 - ref)))

    # bf16 path (default, production setting): loose-ish tolerance because the
    # gathered features travel in bf16 (symmetric fns / accumulation are f32).
    out = mesh_conv_forward(x, edgemat, weight, bias)
    out = jax.block_until_ready(out)
    assert out.shape == (B, Cout, E, 1)
    assert jnp.allclose(out, ref, atol=5e-2, rtol=5e-2), \
        float(jnp.max(jnp.abs(out - ref)))

    print("KERNEL_OK")
</pallas_src>

<mosaic_0001>
module attributes {stable_mosaic.version = 11 : i64} {
  func.func @mesh_conv_kernel(%arg0: i32, %arg1: i32, %arg2: memref<1x5x8x256xf32, #tpu.memory_space<vmem>>, %arg3: memref<16x40xf32, #tpu.memory_space<vmem>>, %arg4: memref<16x1xf32, #tpu.memory_space<vmem>>, %arg5: memref<1x16x256xf32, #tpu.memory_space<vmem>>) attributes {dimension_semantics = [#tpu.dimension_semantics<parallel>, #tpu.dimension_semantics<parallel>], iteration_bounds = array<i64: 2, 1>, scalar_prefetch = 0 : i64, scratch_operands = 0 : i64, tpu.core_type = #tpu.core_type<tc>, window_params = [{transform_indices = @transform_0, window_bounds = array<i64: 1, 5, 8, 256>}, {pipeline_mode = #tpu.pipeline_mode<synchronous>, transform_indices = @transform_1, window_bounds = array<i64: 16, 40>}, {pipeline_mode = #tpu.pipeline_mode<synchronous>, transform_indices = @transform_2, window_bounds = array<i64: 16, 1>}, {transform_indices = @transform_3, window_bounds = array<i64: 1, 16, 256>}]} {
    %c0 = arith.constant 0 : index
    %c0_0 = arith.constant 0 : index
    %c0_1 = arith.constant 0 : index
    %c0_2 = arith.constant 0 : index
    %0 = vector.load %arg2[%c0, %c0_0, %c0_1, %c0_2] : memref<1x5x8x256xf32, #tpu.memory_space<vmem>>, vector<1x1x8x256xf32>
    %1 = vector.shape_cast %0 : vector<1x1x8x256xf32> to vector<8x256xf32>
    %c0_3 = arith.constant 0 : index
    %c1 = arith.constant 1 : index
    %c0_4 = arith.constant 0 : index
    %c0_5 = arith.constant 0 : index
    %2 = vector.load %arg2[%c0_3, %c1, %c0_4, %c0_5] : memref<1x5x8x256xf32, #tpu.memory_space<vmem>>, vector<1x1x8x256xf32>
    %3 = vector.shape_cast %2 : vector<1x1x8x256xf32> to vector<8x256xf32>
    %c0_6 = arith.constant 0 : index
    %c2 = arith.constant 2 : index
    %c0_7 = arith.constant 0 : index
    %c0_8 = arith.constant 0 : index
    %4 = vector.load %arg2[%c0_6, %c2, %c0_7, %c0_8] : memref<1x5x8x256xf32, #tpu.memory_space<vmem>>, vector<1x1x8x256xf32>
    %5 = vector.shape_cast %4 : vector<1x1x8x256xf32> to vector<8x256xf32>
    %c0_9 = arith.constant 0 : index
    %c3 = arith.constant 3 : index
    %c0_10 = arith.constant 0 : index
    %c0_11 = arith.constant 0 : index
    %6 = vector.load %arg2[%c0_9, %c3, %c0_10, %c0_11] : memref<1x5x8x256xf32, #tpu.memory_space<vmem>>, vector<1x1x8x256xf32>
    %7 = vector.shape_cast %6 : vector<1x1x8x256xf32> to vector<8x256xf32>
    %c0_12 = arith.constant 0 : index
    %c4 = arith.constant 4 : index
    %c0_13 = arith.constant 0 : index
    %c0_14 = arith.constant 0 : index
    %8 = vector.load %arg2[%c0_12, %c4, %c0_13, %c0_14] : memref<1x5x8x256xf32, #tpu.memory_space<vmem>>, vector<1x1x8x256xf32>
    %9 = vector.shape_cast %8 : vector<1x1x8x256xf32> to vector<8x256xf32>
    %10 = arith.addf %3, %7 : vector<8x256xf32>
    %11 = arith.addf %5, %9 : vector<8x256xf32>
    %12 = arith.subf %3, %7 : vector<8x256xf32>
    %13 = math.absf %12 : vector<8x256xf32>
    %14 = arith.subf %5, %9 : vector<8x256xf32>
    %15 = math.absf %14 : vector<8x256xf32>
    %16 = tpu.concatenate %1, %10, %11, %13, %15 in 0 : vector<8x256xf32>, vector<8x256xf32>, vector<8x256xf32>, vector<8x256xf32>, vector<8x256xf32> -> vector<40x256xf32>
    %c0_15 = arith.constant 0 : index
    %c0_16 = arith.constant 0 : index
    %17 = vector.load %arg3[%c0_15, %c0_16] : memref<16x40xf32, #tpu.memory_space<vmem>>, vector<16x40xf32>
    %cst = arith.constant dense<0.000000e+00> : vector<16x256xf32>
    %18 = tpu.matmul %17, %16, %cst {dimension_numbers = #tpu.dot_dimension_numbers<[1], [0], [0], [1], [0, 0, 1, 1], [], []>} : vector<16x40xf32>, vector<40x256xf32>, vector<16x256xf32> -> vector<16x256xf32>
    %c0_17 = arith.constant 0 : index
    %c0_18 = arith.constant 0 : index
    %19 = vector.load %arg4[%c0_17, %c0_18] : memref<16x1xf32, #tpu.memory_space<vmem>>, vector<16x1xf32>
    %20 = vector.broadcast %19 : vector<16x1xf32> to vector<16x256xf32>
    %21 = arith.addf %18, %20 : vector<16x256xf32>
    %c0_19 = arith.constant 0 : index
    %c0_20 = arith.constant 0 : index
    %c0_21 = arith.constant 0 : index
    %22 = vector.load %arg5[%c0_19, %c0_20, %c0_21] : memref<1x16x256xf32, #tpu.memory_space<vmem>>, vector<1x16x256xf32>
    %23 = vector.shape_cast %22 : vector<1x16x256xf32> to vector<16x256xf32>
    %24 = vector.shape_cast %21 : vector<16x256xf32> to vector<1x16x256xf32>
    tpu.vector_store %arg5[%c0_19, %c0_20, %c0_21], %24 {strides = array<i32>} : memref<1x16x256xf32, #tpu.memory_space<vmem>>, vector<1x16x256xf32>,
    return
  }
  func.func @transform_0(%arg0: i32, %arg1: i32) -> (i32, i32, i32, i32) {
    %c0_i32 = arith.constant 0 : i32
    %c0_i32_0 = arith.constant 0 : i32
    %c0_i32_1 = arith.constant 0 : i32
    return %arg0, %c0_i32, %c0_i32_0, %arg1 : i32, i32, i32, i32
  }
  func.func @transform_1(%arg0: i32, %arg1: i32) -> (i32, i32) {
    %c0_i32 = arith.constant 0 : i32
    %c0_i32_0 = arith.constant 0 : i32
    %c0_i32_1 = arith.constant 0 : i32
    return %c0_i32, %c0_i32_0 : i32, i32
  }
  func.func @transform_2(%arg0: i32, %arg1: i32) -> (i32, i32) {
    %c0_i32 = arith.constant 0 : i32
    %c0_i32_0 = arith.constant 0 : i32
    %c0_i32_1 = arith.constant 0 : i32
    return %c0_i32, %c0_i32_0 : i32, i32
  }
  func.func @transform_3(%arg0: i32, %arg1: i32) -> (i32, i32, i32) {
    %c0_i32 = arith.constant 0 : i32
    %c0_i32_0 = arith.constant 0 : i32
    return %arg0, %c0_i32, %arg1 : i32, i32, i32
  }
}

</mosaic_0001>

<bundles_post_ra>
// kernel: tpu_custom_call.1
= control target key start
LH: loop header
LB: loop body
LE: loop exit
PB: predicated region body
PF: predicated region fallthrough
CT: control target
= control target key end

     0   :  { %8 = vsyncpa [#allocation3], 0  ;;  %s879_s0 = inlined_call_operand.hbm [shape: f32[2,5,8,256], index: 0, kind: input, shape index: {}]   ;;  %s880_s1 = inlined_call_operand.vmem [shape: f32[16,40], index: 1, kind: input, shape index: {}]   ;;  %s881_s2 = inlined_call_operand.vmem [shape: f32[16,1], index: 2, kind: input, shape index: {}]   ;;  %s882_s3 = inlined_call_operand.hbm [shape: f32[2,16,256], index: 3, kind: output, shape index: {}]  }
   0x1   :  { %10 = vsyncpa [#allocation3 + $0x1], 0 }
   0x2   :  { %11 = vsyncpa [#allocation4], 0 }
   0x3   :  { %13 = vsyncpa [#allocation4 + $0x1], 0  ;;  %s691_s12 = smov 0   ;;  %s693_s13 = smov 0  }
   0x4   :  { %s695_s14 = smov 0   ;;  %s697_s15 = smov 0  }
   0x5   :  { %s699_s16 = smov 0   ;;  %s701_s17 = smov 0  }
   0x6 LB: > { %s440_s18 = sadd.s32 4294967295, %s661_s17   ;;  %s441_s19 = sadd.s32 4294967294, %s661_s17   ;;  %s661_s17 = sphi %s701_s17, %s19_s17   ;;  %s657_s16 = sphi %s699_s16, %s897_s16   ;;  %s653_s15 = sphi %s697_s15, %s896_s15   ;;  %s649_s14 = sphi %s695_s14, %s895_s14   ;;  %s645_s13 = sphi %s693_s13, %s894_s13   ;;  %s641_s12 = sphi %s691_s12, %s893_s12  }
   0x7   : > { %s31_s20 = sadd.s32 1, %s657_s16  ;;  %s40_s21 = sadd.s32 1, %s649_s14 }
   0x8   : > { %p33_p0 = scmp.ge.s32.totalorder %s31_s20, 2  ;;  %p47_p1 = scmp.ne.s32.totalorder %s649_s14, %s645_s13 }
   0x9   : > { %p48_p2 = scmp.eq.s32.totalorder %s661_s17, 0  ;;  %p53_p3 = scmp.ne.s32.totalorder %s645_s13, %s641_s12 }
   0xa   : > { %s899_s20 = smov (%p33_p0, %s31_s20), 0  ;;  %p54_p5 = scmp.eq.s32.totalorder %s440_s18, 0 }
   0xb   : > { %p732_p4 = por %p48_p2, %p47_p1  ;;  %s35_s23 = ssub.s32 %s657_s16, %s899_s20 }
   0xc   : > { %p121_p6 = scmp.eq.s32.totalorder %s440_s18, 1  ;;  %p38_p7 = scmp.eq.s32.totalorder %s35_s23, 0 }
   0xd   : > { %p738_p8 = por %p54_p5, %p53_p3  ;;  %p127_p10 = scmp.eq.s32.totalorder %s441_s19, 1 }
   0xe   : > { %p742_p9 = por %p121_p6, %p47_p1  ;;  %p492_p13 = scmp.lt.s32.totalorder %s661_s17, 2 }
   0xf   : > { %s747_s26 = scalar_select %p38_p7, %s649_s14, %s40_s21  }
  0x10   : > { %s886_s25 = scalar_select %p742_p9, 1, 0 }
  0x11   : > { %p749_p11 = por %p127_p10, %p53_p3  ;;  %s153_s28 = sand.u32 1, %s649_s14  }
  0x12   : > { %s477_s29 = smul.u32 80, %s153_s28  ;;  %p759_p0 = pnand %p492_p13, %p732_p4 }
  0x13   : > { %s887_s27 = scalar_select %p749_p11, 1, 0 }
  0x14   : > { %s478_s30 = smul.u32 1280, %s657_s16  ;;  %s157_s8 = scalar_lea.vmem [#allocation2], %s477_s29 }
  0x15   : > { %s166_s9 = sshll.u32 %s157_s8, 4  ;;  %s771_s10 = scalar_lea.sflag [#allocation3], %s153_s28  ;;  %s768_s9 = int_to_ptr.vmem [resolvable:$true] %s166_s9 }
  0x16   : > { %s766_s7 = scalar_lea.hbm %s879_s0, %s478_s30  ;;  %p551_p3 = pneg %p759_p0 }
  0x17   : > { %s549_s11 = scalar_lea.hbm %s766_s7, 1280  ;;  %s554_s21 = scalar_lea.hbm %s879_s0, 2560 }
  0x18   : > { %p550_p2 = scmp.ne.s32.totalorder %s766_s7, %s549_s11  ;;  %p555_p6 = scmp.lt.u32.totalorder %s766_s7, %s879_s0 }
  0x19   : > { %p556_p7 = scmp.lt.u32.totalorder %s554_s21, %s549_s11  ;;  %p558_p13 = scmp.lt.u32.totalorder %s549_s11, %s766_s7 }
  0x1a   : > { %p552_p4 = pnand %p551_p3, %p550_p2 }
  0x1b   : > { %p557_p10 = por %p556_p7, %p555_p6 }
  0x1c   : > { %p553_p5 = pneg %p552_p4 }
  0x1d   : > { %p559_p12 = por %p558_p13, %p557_p10 }
  0x1f   : > { %p560_p1 = pnand %p559_p12, %p553_p5 }
  0x21   : > { %563 = shalt.err (!%p560_p1)
}
  0x22   : > { %s564_s28 = scalar_lea.vmem %s768_s9, 1280  ;;  %s663_s29 = smov [#allocation2]  }
  0x23   : > { %p565_p2 = scmp.ne.s32.totalorder %s768_s9, %s564_s28  ;;  %s569_s30 = sshll.u32 %s663_s29, 4  ;;  %s570_s30 = int_to_ptr.vmem [resolvable:$false] %s569_s30 }
  0x24   : > { %s571_s5 = scalar_lea.vmem %s570_s30, 2560  ;;  %p572_p9 = scmp.lt.s32.totalorder %s768_s9, %s570_s30 }
  0x25   : > { %p567_p4 = pnand %p565_p2, %p551_p3  ;;  %p573_p6 = scmp.lt.s32.totalorder %s571_s5, %s564_s28 }
  0x27   : > { %p568_p11 = pneg %p567_p4  ;;  %p574_p7 = por %p573_p6, %p572_p9 }
  0x29   : > { %p575_p10 = pnand %p574_p7, %p568_p11 }
  0x2b   : > { %578 = shalt.err (!%p575_p10)
}
  0x2c   : > { %s664_s6 = smov 256   ;;  %s665_s8 = smov 16  }
  0x2d   : > { %487 = dma.hbm_to_vmem [thread:$0]  (!%p759_p0), %s766_s7, 1280, %s768_s9, %s771_s10, %s664_s6, %s664_s6, %s665_s8  }
  0x2e   : > { %p174_p12 = scmp.lt.s32.totalorder %s661_s17, 3  ;;  %p889_p1 = scmp.ge.s32.totalorder %s661_s17, 1 }
  0x30   : > { %p175_p3 = pnand %p889_p1, %p174_p12 }
  0x31   : > { %s803_s11 = sand.u32 (!%p175_p3), 1, %s645_s13  }
  0x32   : > { %178 = sbr.rel (%p175_p3) target bundleno = 304 (0x130), region = 32  ;;  %s181_s19 = scalar_lea.sflag (!%p175_p3), [#allocation3], %s803_s11 }
  0x33   : > { %s479_s18 = smul.u32 (!%p175_p3), 80, %s803_s11 }
  0x35   : > { %s184_s21 = scalar_lea.vmem (!%p175_p3), [#allocation2], %s479_s18 }
  0x39   : > { %632 = dma.done.wait (%p738_p8), %s181_s19, 1280  }
  0x3a   : > { %634 = vsyncadd (%p738_p8), %s181_s19, 4294966016  ;;  %v666_v0 = vmov 0.0   ;;  %v667_v1 = vmov 0   ;;  %v210_v2 = vld [vmem:[%s184_s21 + $0x8] sm:$0xff]  ;;  %v448_v3 = vld [vmem:[%s184_s21 + $0x18] sm:$0xff]  ;;  %vm249_vm0 = vcmask 326656  }
  0x3b   : > { %320 = vmatprep.mubr.f32.mxu0 %v666_v0  ;;  %326 = vmatprep.mubr.f32.mxu1 %v666_v0  ;;  %v452_v4 = vld [vmem:[%s184_s21 + $0x38] sm:$0xff]  ;;  %v209_v7 = vld [vmem:[%s184_s21] sm:$0xff]  ;;  %v447_v8 = vld [vmem:[%s184_s21 + $0x10] sm:$0xff]  ;;  %s446_s29 = sshll.u32 %s803_s11, 5  ;;  %s462_s6 = sshll.u32 %s653_s15, 9 }
  0x3c   : > { %548 = vset.pattern.permute.xlu0 %v667_v1  ;;  %v224_v5 = vadd.f32 %v452_v4, %v448_v3  ;;  %v228_v6 = vsub.f32 %v448_v3, %v452_v4  ;;  %v451_v9 = vld [vmem:[%s184_s21 + $0x30] sm:$0xff]  ;;  %v450_v12 = vld [vmem:[%s184_s21 + $0x28] sm:$0xff]  ;;  %v449_v14 = vld [vmem:[%s184_s21 + $0x20] sm:$0xff]  ;;  %s206_s30 = scalar_lea.vmem [#allocation5], %s446_s29  ;;  %s830_s19 = scalar_lea.hbm %s882_s3, %s462_s6 }
  0x3d   : > { %v223_v10 = vadd.f32 %v451_v9, %v447_v8  ;;  %v227_v11 = vsub.f32 %v447_v8, %v451_v9  ;;  %v454_v13 = vld [vmem:[%s184_s21 + $0x48] sm:$0xff]  ;;  %v453_v18 = vld [vmem:[%s184_s21 + $0x40] sm:$0xff]  ;;  %s353_s5 = sshll.u32 %s206_s30, 4  ;;  %s338_s15 = scalar_lea.sflag [#allocation4], %s803_s11  ;;  %s825_s5 = int_to_ptr.vmem [resolvable:$true] %s353_s5 }
  0x3e   : > { %v463_v15 = vpack.c.bf16 %v224_v5, %v210_v2  ;;  %v226_v16 = vadd.f32 %v454_v13, %v450_v12  ;;  %v230_v17 = vand.u32 2147483647, %v228_v6  ;;  %v232_v19 = vsub.f32 %v450_v12, %v454_v13  ;;  %v237_v24 = vld [vmem:[%s881_s2] sm:$0xff]  ;;  %v238_v28 = vld [vmem:[%s881_s2 + $0x8] sm:$0xff]  ;;  %s579_s21 = scalar_lea.vmem %s825_s5, 512  ;;  %p890_p9 = scmp.ne.s32.totalorder %s886_s25, 0 }
  0x3f   : > { %v465_v20 = vpack.c.bf16 %v223_v10, %v209_v7  ;;  %v225_v21 = vadd.f32 %v453_v18, %v449_v14  ;;  %v229_v22 = vand.u32 2147483647, %v227_v11  ;;  %v231_v26 = vsub.f32 %v449_v14, %v453_v18  ;;  %241 = vperm.xlu0 %548, %v237_v24   ;;  %v235_v30 = vld [vmem:[%s880_s1] sm:$0xff]  ;;  %v236_v31 = vld [vmem:[%s880_s1 + $0x8] sm:$0xff]  ;;  %p580_p8 = scmp.ne.s32.totalorder %s825_s5, %s579_s21  ;;  %s668_s24 = smov [#allocation5]  }
  0x40   : > { %464 = vmatprep.subr.bf16.mxu0 %v463_v15  ;;  %471 = vmatprep.subr.bf16.mxu1 %v463_v15  ;;  %v467_v23 = vpack.c.bf16 %v230_v17, %v226_v16  ;;  %v234_v27 = vand.u32 2147483647, %v232_v19  ;;  %s583_s4 = sshll.u32 %s668_s24, 4  ;;  %s584_s4 = int_to_ptr.vmem [resolvable:$false] %s583_s4 }
  0x41   : > { %466 = vmatpush1.bf16.msra.mxu0 %v465_v20  ;;  %474 = vmatpush1.bf16.msra.mxu1 %v465_v20  ;;  %v469_v25 = vpack.c.bf16 %v229_v22, %v225_v21  ;;  %v233_v29 = vand.u32 2147483647, %v231_v26  ;;  %p581_p11 = pnand %p580_p8, %p890_p9  ;;  %s585_s7 = scalar_lea.vmem %s584_s4, 1024 }
  0x42   : > { %468 = vmatprep.subr.bf16.mxu0 %v467_v23  ;;  %472 = vmatprep.subr.bf16.mxu1 %v467_v23  ;;  %p586_p5 = scmp.lt.s32.totalorder %s825_s5, %s584_s4  ;;  %p587_p13 = scmp.lt.s32.totalorder %s585_s7, %s579_s21 }
  0x43   : > { %246 = vperm.xlu0 %548, %v238_v28   ;;  %p582_p0 = pneg %p581_p11 }
  0x44   : > { %p588_p2 = por %p587_p13, %p586_p5 }
  0x45   : > { %470 = vmatpush1.bf16.msra.mxu0 %v469_v25  ;;  %475 = vmatpush1.bf16.msra.mxu1 %v469_v25 }
  0x46   : > { %264 = vmatprep.subr.mxu0 %v234_v27  ;;  %473 = vmatprep.subr.mxu1 %v234_v27  ;;  %p589_p4 = pnand %p588_p2, %p582_p0 }
  0x49   : > { %265 = vmatpush1.msra.mxu0 %v233_v29  ;;  %476 = vmatpush1.msra.mxu1 %v233_v29 }
  0x4a   : > { %455 = vmatmul.mubr.msk.f32.vlgmr.msra.gmra.mrb[0].mxu0 %vm249_vm0, %v235_v30  ;;  %456 = vmatmul.mubr.msk.f32.vlgmr.msra.gmra.mrb[0].mxu1 %vm249_vm0, %v236_v31 }
  0xbe   : > { %v242_v32 = vpop.permute.xlu0 %241 }
  0xc2   : > { %v247_v33 = vpop.permute.xlu0 %246 }
 0x11d   : > { %v322_v34 = vpop.f32.mrb[0].mxu0  ;;  %v328_v35 = vpop.f32.mrb[0].mxu1 }
 0x11e   : > { %v323_v36 = vadd.f32 %v322_v34, %v242_v32  ;;  %v329_v37 = vadd.f32 %v328_v35, %v247_v33  ;;  %v324_v38 = vpop.f32.mrb[1].mxu0  ;;  %v330_v39 = vpop.f32.mrb[1].mxu1 }
 0x11f   : > { %v325_v40 = vadd.f32 %v324_v38, %v242_v32  ;;  %v331_v41 = vadd.f32 %v330_v39, %v247_v33 }
 0x120   : > { %333 = vst [vmem:[%s206_s30] sm:$0xff] %v323_v36  ;;  %335 = vst [vmem:[%s206_s30 + $0x10] sm:$0xff] %v329_v37 }
 0x121   : > { %334 = vst [vmem:[%s206_s30 + $0x8] sm:$0xff] %v325_v40  ;;  %336 = vst [vmem:[%s206_s30 + $0x18] sm:$0xff] %v331_v41 }
 0x122   : > { %592 = shalt.err (!%p589_p4)
}
 0x123   : > { %s593_s9 = scalar_lea.hbm %s830_s19, 512  ;;  %s597_s23 = scalar_lea.hbm %s882_s3, 1024 }
 0x124   : > { %p594_p6 = scmp.ne.s32.totalorder %s830_s19, %s593_s9  ;;  %p598_p12 = scmp.lt.u32.totalorder %s830_s19, %s882_s3 }
 0x125   : > { %p599_p1 = scmp.lt.u32.totalorder %s597_s23, %s593_s9  ;;  %p601_p8 = scmp.lt.u32.totalorder %s593_s9, %s830_s19 }
 0x126   : > { %p595_p7 = pnand %p594_p6, %p890_p9 }
 0x127   : > { %p600_p3 = por %p599_p1, %p598_p12 }
 0x128   : > { %p596_p10 = pneg %p595_p7 }
 0x129   : > { %p602_p11 = por %p601_p8, %p600_p3 }
 0x12b   : > { %p603_p0 = pnand %p602_p11, %p596_p10 }
 0x12d   : > { %606 = shalt.err (!%p603_p0)
}
 0x12e   : > { %s669_s30 = smov 256   ;;  %s670_s6 = smov 16  }
 0x12f   : > { %482 = dma.vmem_to_hbm [thread:$0]  (%p890_p9), %s825_s5, 512, %s830_s19, %s338_s15, %s669_s30, %s669_s30, %s670_s6  }
 0x130 PF: > { %s368_s8 = sand.u32 1, %s641_s12   ;;  %p891_p5 = scmp.ne.s32.totalorder %s887_s27, 0 }
 0x131   : > { %p892_p13 = scmp.ge.s32.totalorder %s661_s17, 2  ;;  %s369_s18 = scalar_lea.sflag [#allocation4], %s368_s8 }
 0x133   : > { %p489_p2 = pnand %p892_p13, %p891_p5 }
 0x135   : > { %636 = dma.done.wait (!%p489_p2), %s369_s18, 512  }
 0x136   : > { %638 = vsyncadd (!%p489_p2), %s369_s18, 4294966784  ;;  %s19_s17 = sadd.s32 1, %s661_s17   ;;  %s893_s12 = smov %s645_s13 }
 0x137   : > { %p16_p4 = scmp.ge.s32.totalorder %s19_s17, 4   ;;  %s894_s13 = smov %s649_s14 }
 0x138   : > { %s895_s14 = smov %s747_s26  ;;  %s896_s15 = smov %s657_s16 }
 0x139   : > { %s897_s16 = smov %s899_s20  ;;  %18 = sbr.rel (!%p16_p4) target bundleno = 6 (0x6), region = 81 }
 0x140   :  { %374 = vsyncpa [#allocation3], 1 }
 0x141   :  { %376 = vsyncpa [#allocation3 + $0x1], 1 }
 0x142   :  { %377 = vsyncpa [#allocation4], 1 }
 0x143   :  { %379 = vsyncpa [#allocation4 + $0x1], 1 }

</bundles_post_ra>
